<compile_context>
chip_gen: v7x
topology: tpu7x:2x2x1
jax: 0.10.0
libtpu: 0.0.40
codegen_flags: <defaults>
</compile_context>

<pallas_src>
import jax
import jax.numpy as jnp
from jax.experimental import pallas as pl
from jax.experimental.pallas import tpu as pltpu

_LANE = 128
_SUBLANE = 8
_C_CHUNK = 2048                 # category chunk (lanes); multiple of 256 and 128
_B_TILE = 256                   # max batch rows per tile
_VMEM_LIMIT = 48 * 1024 * 1024  # > 32 MiB scoped default, < v7x 64 MiB physical


def _round_up(x, m):
    return ((x + m - 1) // m) * m


# ----------------------------- Pallas kernels ------------------------------- #
def _pooler_and_init(pooled_ref, pw_ref, pb_ref, cls_sc, m_sc, l_sc):
    """Fused BERT pooler (dense+tanh) + online-softmax state init."""
    h = jnp.dot(pooled_ref[...], pw_ref[...],
                preferred_element_type=jnp.float32) + pb_ref[...]
    cls_sc[...] = jnp.tanh(h).astype(cls_sc.dtype)      # bf16 MXU operand
    m_sc[...] = jnp.full_like(m_sc, -1e30)               # finite "-inf"
    l_sc[...] = jnp.zeros_like(l_sc)


def _online_softmax_update(logits, m_sc, l_sc):
    m_new = jnp.maximum(m_sc[...], jnp.max(logits, axis=-1, keepdims=True))
    l_sc[...] = (l_sc[...] * jnp.exp(m_sc[...] - m_new)
                 + jnp.sum(jnp.exp(logits - m_new), axis=-1, keepdims=True))
    m_sc[...] = m_new


def _infer_kernel(pooled_ref, pw_ref, pb_ref, cw_ref, cb_ref,
                  logits_ref, lse_ref, cls_sc, m_sc, l_sc):
    c = pl.program_id(1)

    @pl.when(c == 0)
    def _():  # pooler hoisted: runs once per batch tile, not once per chunk
        _pooler_and_init(pooled_ref, pw_ref, pb_ref, cls_sc, m_sc, l_sc)

    logits = jnp.dot(cls_sc[...], cw_ref[...],
                     preferred_element_type=jnp.float32) + cb_ref[...]
    logits_ref[...] = logits.astype(logits_ref.dtype)     # bf16 writeback
    _online_softmax_update(logits, m_sc, l_sc)

    @pl.when(c == pl.num_programs(1) - 1)
    def _():
        lse_ref[...] = m_sc[...] + jnp.log(l_sc[...])


def _train_kernel(pooled_ref, pw_ref, pb_ref, cw_ref, cb_ref, y_ref,
                  nll_ref, cls_sc, m_sc, l_sc, t_sc):
    c = pl.program_id(1)

    @pl.when(c == 0)
    def _():
        _pooler_and_init(pooled_ref, pw_ref, pb_ref, cls_sc, m_sc, l_sc)
        t_sc[...] = jnp.zeros_like(t_sc)

    logits = jnp.dot(cls_sc[...], cw_ref[...],
                     preferred_element_type=jnp.float32) + cb_ref[...]
    _online_softmax_update(logits, m_sc, l_sc)

    # true-class logit via predicate select (no int->f32 one-hot multiply).
    # padded classes carry bias -1e30 but their column id can never equal a
    # real label, so the select keeps the padding convention NaN-safe.
    col0 = c * logits.shape[-1]
    col_ids = col0 + jax.lax.broadcasted_iota(jnp.int32, logits.shape, 1)
    t_sc[...] += jnp.sum(jnp.where(col_ids == y_ref[...], logits, 0.0),
                         axis=-1, keepdims=True)

    @pl.when(c == pl.num_programs(1) - 1)
    def _():  # per-row NLL in log-space: logsumexp - true logit
        nll_ref[...] = (m_sc[...] + jnp.log(l_sc[...])) - t_sc[...]


# ----------------------------- Head wrappers -------------------------------- #
def _head_specs(b_tile, D, c_chunk):
    return [
        pl.BlockSpec((b_tile, D), lambda i, c: (i, 0)),    # pooled (per batch tile)
        pl.BlockSpec((D, D), lambda i, c: (0, 0)),          # pooler W (fetched once)
        pl.BlockSpec((1, D), lambda i, c: (0, 0)),           # pooler b
        pl.BlockSpec((D, c_chunk), lambda i, c: (0, c)),      # classifier W chunk
        pl.BlockSpec((1, c_chunk), lambda i, c: (0, c)),      # classifier b chunk
    ]


def _infer_head(pooled, pw, pb, cw, cb, b_tile, c_chunk):
    Bp, D = pooled.shape
    Cp = cw.shape[1]
    grid_spec = pltpu.PrefetchScalarGridSpec(
        num_scalar_prefetch=0,
        grid=(Bp // b_tile, Cp // c_chunk),
        in_specs=_head_specs(b_tile, D, c_chunk),
        out_specs=[
            pl.BlockSpec((b_tile, c_chunk), lambda i, c: (i, c)),  # logits (bf16)
            pl.BlockSpec((b_tile, 1), lambda i, c: (i, 0)),        # lse (f32)
        ],
        scratch_shapes=[
            pltpu.VMEM((b_tile, D), jnp.bfloat16),   # pooled/tanh'd cls token
            pltpu.VMEM((b_tile, 1), jnp.float32),    # running max
            pltpu.VMEM((b_tile, 1), jnp.float32),    # running sum-exp
        ],
    )
    return pl.pallas_call(
        _infer_kernel,
        out_shape=(jax.ShapeDtypeStruct((Bp, Cp), jnp.bfloat16),
                   jax.ShapeDtypeStruct((Bp, 1), jnp.float32)),
        grid_spec=grid_spec,
        compiler_params=pltpu.CompilerParams(
            dimension_semantics=("parallel", "arbitrary"),
            vmem_limit_bytes=_VMEM_LIMIT),
    )(pooled, pw, pb, cw, cb)


def _train_head(pooled, pw, pb, cw, cb, y2d, b_tile, c_chunk):
    Bp, D = pooled.shape
    Cp = cw.shape[1]
    grid_spec = pltpu.PrefetchScalarGridSpec(
        num_scalar_prefetch=0,
        grid=(Bp // b_tile, Cp // c_chunk),
        in_specs=_head_specs(b_tile, D, c_chunk)
        + [pl.BlockSpec((b_tile, 1), lambda i, c: (i, 0))],        # labels
        out_specs=[pl.BlockSpec((b_tile, 1), lambda i, c: (i, 0))],  # per-row NLL
        scratch_shapes=[
            pltpu.VMEM((b_tile, D), jnp.bfloat16),
            pltpu.VMEM((b_tile, 1), jnp.float32),
            pltpu.VMEM((b_tile, 1), jnp.float32),
            pltpu.VMEM((b_tile, 1), jnp.float32),    # accumulated true logit
        ],
    )
    (nll,) = pl.pallas_call(
        _train_kernel,
        out_shape=(jax.ShapeDtypeStruct((Bp, 1), jnp.float32),),
        grid_spec=grid_spec,
        compiler_params=pltpu.CompilerParams(
            dimension_semantics=("parallel", "arbitrary"),
            vmem_limit_bytes=_VMEM_LIMIT),
    )(pooled, pw, pb, cw, cb, y2d)
    return nll


# ----------------------------- Model wrapper -------------------------------- #
class MyModelPallas:
    """JAX/Pallas re-implementation of MyModel.forward."""

    def __init__(self, word_dim, category, vocab_size, key):
        k_emb, k_pw, k_pb, k_cw, k_cb = jax.random.split(key, 5)
        self.word_dim = word_dim
        self.category = category

        # lane-dense, chunk-aligned padding of the category axis
        cpad = _round_up(category, _LANE)
        if cpad > _C_CHUNK:
            self.c_chunk = _C_CHUNK
            cpad = _round_up(cpad, self.c_chunk)
        else:
            self.c_chunk = cpad
        self.cpad = cpad

        # TODO(synk): the pretrained BERT encoder (external checkpoint) has no
        # Pallas equivalent; a deterministic embedding+mean-pool stand-in
        # produces the pooled token; its dense+tanh pooler IS fused in-kernel.
        self.embedding = jax.random.normal(
            k_emb, (vocab_size, word_dim), jnp.float32) * 0.02
        # pooler weights stored bf16 (MXU operands), bias f32
        self.pooler_w = (jax.random.normal(
            k_pw, (word_dim, word_dim), jnp.float32) * 0.02).astype(jnp.bfloat16)
        self.pooler_b = (jax.random.normal(
            k_pb, (word_dim,), jnp.float32) * 0.02).reshape(1, -1)
        # nn.Linear(word_dim, category): torch weight [C, D] -> stored [D, Cp],
        # zero-padded; padded bias = -1e30 so padded classes get zero prob.
        w_t = (jax.random.normal(
            k_cw, (category, word_dim), jnp.float32) * 0.02).T
        b = jax.random.normal(k_cb, (category,), jnp.float32) * 0.02
        self.cls_w = (jnp.zeros((word_dim, self.cpad), jnp.float32)
                      .at[:, :category].set(w_t)).astype(jnp.bfloat16)
        self.cls_b = (jnp.full((1, self.cpad), -1e30, jnp.float32)
                      .at[0, :category].set(b))

    def _bert_stub(self, x_ids):
        # x_ids: [B, S] int32 -> pooled [B, D] f32 (gather + mean, plain JAX)
        emb = jnp.take(self.embedding, x_ids, axis=0)          # [B, S, D]
        return jnp.mean(emb, axis=1)                            # [B, D]

    def _batch_tiling(self, B):
        Bp = _round_up(B, _SUBLANE)
        if Bp > _B_TILE:
            b_tile = _B_TILE
            Bp = _round_up(Bp, b_tile)
        else:
            b_tile = Bp
        return Bp, b_tile

    def forward(self, x_ids, y=None):
        pooled = self._bert_stub(x_ids)
        B = pooled.shape[0]
        Bp, b_tile = self._batch_tiling(B)
        pooled_p = (jnp.zeros((Bp, self.word_dim), jnp.float32)
                    .at[:B].set(pooled)).astype(jnp.bfloat16)

        if y is None:
            logits, lse = _infer_head(pooled_p, self.pooler_w, self.pooler_b,
                                      self.cls_w, self.cls_b,
                                      b_tile, self.c_chunk)
            # deferred normalization (exact): probs = exp(logits - logsumexp)
            probs = jnp.exp(logits.astype(jnp.float32) - lse)
            if Bp == B and self.cpad == self.category:
                return probs            # no padding -> no wrapper slice
            return probs[:B, :self.category]

        y2d = (jnp.zeros((Bp, 1), jnp.int32)
               .at[:B, 0].set(y.astype(jnp.int32)))
        nll = _train_head(pooled_p, self.pooler_w, self.pooler_b,
                          self.cls_w, self.cls_b, y2d, b_tile, self.c_chunk)
        # cal_loss: sum over the batch of -log(prob of true class)
        return jnp.sum(nll[:B, 0])


# --------------------------------- Main -------------------------------------- #
if __name__ == "__main__":
    key = jax.random.PRNGKey(0)
    k_model, k_x, k_y = jax.random.split(key, 3)

    batch, seq, word_dim, category, vocab = 2, 8, 32, 8, 64
    model = MyModelPallas(word_dim, category, vocab, k_model)

    x = jax.random.randint(k_x, (batch, seq), 0, vocab, dtype=jnp.int32)
    y = jax.random.randint(k_y, (batch,), 0, category, dtype=jnp.int32)

    # inference path: softmax probabilities [B, C]
    probs = jax.block_until_ready(model.forward(x))
    # training path: cal_loss scalar
    loss = jax.block_until_ready(model.forward(x, y))

    # plain-JAX reference (same bf16 operands / f32 accumulation)
    pooled_ref = model._bert_stub(x).astype(jnp.bfloat16)
    cls_ref = jnp.tanh(jnp.dot(pooled_ref, model.pooler_w,
                               preferred_element_type=jnp.float32)
                       + model.pooler_b)
    logits_ref = (jnp.dot(cls_ref.astype(jnp.bfloat16),
                          model.cls_w[:, :category],
                          preferred_element_type=jnp.float32)
                  + model.cls_b[:, :category])
    probs_ref = jax.nn.softmax(logits_ref, axis=-1)
    lse_ref = jax.nn.logsumexp(logits_ref, axis=-1)
    loss_ref = jnp.sum(lse_ref - logits_ref[jnp.arange(batch), y])

    assert probs.shape == (batch, category)
    assert bool(jnp.all(jnp.isfinite(probs)))
    assert bool(jnp.allclose(jnp.sum(probs, axis=-1), 1.0, atol=5e-3))
    assert bool(jnp.allclose(probs, probs_ref, atol=5e-3))
    assert bool(jnp.isfinite(loss))
    assert bool(jnp.allclose(loss, loss_ref, rtol=1e-2, atol=1e-3))

    print("KERNEL_OK")
</pallas_src>

<mosaic_0001>
module attributes {stable_mosaic.version = 11 : i64} {
  func.func @_infer_kernel(%arg0: i32, %arg1: i32, %arg2: memref<8x32xbf16, #tpu.memory_space<vmem>>, %arg3: memref<32x32xbf16, #tpu.memory_space<vmem>>, %arg4: memref<1x32xf32, #tpu.memory_space<vmem>>, %arg5: memref<32x128xbf16, #tpu.memory_space<vmem>>, %arg6: memref<1x128xf32, #tpu.memory_space<vmem>>, %arg7: memref<8x128xbf16, #tpu.memory_space<vmem>>, %arg8: memref<8x1xf32, #tpu.memory_space<vmem>>, %arg9: memref<8x32xbf16, #tpu.memory_space<vmem>>, %arg10: memref<8x1xf32, #tpu.memory_space<vmem>>, %arg11: memref<8x1xf32, #tpu.memory_space<vmem>>) attributes {dimension_semantics = [#tpu.dimension_semantics<parallel>, #tpu.dimension_semantics<arbitrary>], iteration_bounds = array<i64: 1, 1>, scalar_prefetch = 0 : i64, scratch_operands = 3 : i64, tpu.core_type = #tpu.core_type<tc>, window_params = [{transform_indices = @transform_0, window_bounds = array<i64: 8, 32>}, {pipeline_mode = #tpu.pipeline_mode<synchronous>, transform_indices = @transform_1, window_bounds = array<i64: 32, 32>}, {pipeline_mode = #tpu.pipeline_mode<synchronous>, transform_indices = @transform_2, window_bounds = array<i64: 1, 32>}, {transform_indices = @transform_3, window_bounds = array<i64: 32, 128>}, {transform_indices = @transform_4, window_bounds = array<i64: 1, 128>}, {transform_indices = @transform_5, window_bounds = array<i64: 8, 128>}, {transform_indices = @transform_6, window_bounds = array<i64: 8, 1>}]} {
    %c0_i32 = arith.constant 0 : i32
    %0 = arith.cmpi eq, %arg1, %c0_i32 : i32
    %1 = arith.extui %0 : i1 to i32
    %c0_i32_0 = arith.constant 0 : i32
    %2 = arith.cmpi ne, %1, %c0_i32_0 : i32
    scf.if %2 {
      %c0_22 = arith.constant 0 : index
      %c0_23 = arith.constant 0 : index
      %31 = vector.load %arg2[%c0_22, %c0_23] : memref<8x32xbf16, #tpu.memory_space<vmem>>, vector<8x32xbf16>
      %c0_24 = arith.constant 0 : index
      %c0_25 = arith.constant 0 : index
      %32 = vector.load %arg3[%c0_24, %c0_25] : memref<32x32xbf16, #tpu.memory_space<vmem>>, vector<32x32xbf16>
      %cst_26 = arith.constant dense<0.000000e+00> : vector<8x32xf32>
      %33 = tpu.matmul %31, %32, %cst_26 {dimension_numbers = #tpu.dot_dimension_numbers<[1], [0], [0], [1], [0, 0, 1, 1], [], []>} : vector<8x32xbf16>, vector<32x32xbf16>, vector<8x32xf32> -> vector<8x32xf32>
      %c0_27 = arith.constant 0 : index
      %c0_28 = arith.constant 0 : index
      %34 = vector.load %arg4[%c0_27, %c0_28] : memref<1x32xf32, #tpu.memory_space<vmem>>, vector<1x32xf32>
      %35 = vector.broadcast %34 : vector<1x32xf32> to vector<8x32xf32>
      %36 = arith.addf %33, %35 : vector<8x32xf32>
      %37 = math.tanh %36 : vector<8x32xf32>
      %38 = arith.truncf %37 : vector<8x32xf32> to vector<8x32xbf16>
      %c0_29 = arith.constant 0 : index
      %c0_30 = arith.constant 0 : index
      %39 = vector.load %arg9[%c0_29, %c0_30] : memref<8x32xbf16, #tpu.memory_space<vmem>>, vector<8x32xbf16>
      tpu.vector_store %arg9[%c0_29, %c0_30], %38 {strides = array<i32>} : memref<8x32xbf16, #tpu.memory_space<vmem>>, vector<8x32xbf16>,
      %cst_31 = arith.constant -1.000000e+30 : f32
      %40 = vector.broadcast %cst_31 : f32 to vector<8x1xf32>
      %c0_32 = arith.constant 0 : index
      %c0_33 = arith.constant 0 : index
      %41 = vector.load %arg10[%c0_32, %c0_33] : memref<8x1xf32, #tpu.memory_space<vmem>>, vector<8x1xf32>
      tpu.vector_store %arg10[%c0_32, %c0_33], %40 {strides = array<i32>} : memref<8x1xf32, #tpu.memory_space<vmem>>, vector<8x1xf32>,
      %cst_34 = arith.constant 0.000000e+00 : f32
      %42 = vector.broadcast %cst_34 : f32 to vector<8x1xf32>
      %c0_35 = arith.constant 0 : index
      %c0_36 = arith.constant 0 : index
      %43 = vector.load %arg11[%c0_35, %c0_36] : memref<8x1xf32, #tpu.memory_space<vmem>>, vector<8x1xf32>
      tpu.vector_store %arg11[%c0_35, %c0_36], %42 {strides = array<i32>} : memref<8x1xf32, #tpu.memory_space<vmem>>, vector<8x1xf32>,
    } else {
    }
    %c0 = arith.constant 0 : index
    %c0_1 = arith.constant 0 : index
    %3 = vector.load %arg9[%c0, %c0_1] : memref<8x32xbf16, #tpu.memory_space<vmem>>, vector<8x32xbf16>
    %c0_2 = arith.constant 0 : index
    %c0_3 = arith.constant 0 : index
    %4 = vector.load %arg5[%c0_2, %c0_3] : memref<32x128xbf16, #tpu.memory_space<vmem>>, vector<32x128xbf16>
    %cst = arith.constant dense<0.000000e+00> : vector<8x128xf32>
    %5 = tpu.matmul %3, %4, %cst {dimension_numbers = #tpu.dot_dimension_numbers<[1], [0], [0], [1], [0, 0, 1, 1], [], []>} : vector<8x32xbf16>, vector<32x128xbf16>, vector<8x128xf32> -> vector<8x128xf32>
    %c0_4 = arith.constant 0 : index
    %c0_5 = arith.constant 0 : index
    %6 = vector.load %arg6[%c0_4, %c0_5] : memref<1x128xf32, #tpu.memory_space<vmem>>, vector<1x128xf32>
    %7 = vector.broadcast %6 : vector<1x128xf32> to vector<8x128xf32>
    %8 = arith.addf %5, %7 : vector<8x128xf32>
    %9 = arith.truncf %8 : vector<8x128xf32> to vector<8x128xbf16>
    %c0_6 = arith.constant 0 : index
    %c0_7 = arith.constant 0 : index
    %10 = vector.load %arg7[%c0_6, %c0_7] : memref<8x128xbf16, #tpu.memory_space<vmem>>, vector<8x128xbf16>
    tpu.vector_store %arg7[%c0_6, %c0_7], %9 {strides = array<i32>} : memref<8x128xbf16, #tpu.memory_space<vmem>>, vector<8x128xbf16>,
    %c0_8 = arith.constant 0 : index
    %c0_9 = arith.constant 0 : index
    %11 = vector.load %arg10[%c0_8, %c0_9] : memref<8x1xf32, #tpu.memory_space<vmem>>, vector<8x1xf32>
    %cst_10 = arith.constant dense<0xFF800000> : vector<8xf32>
    %12 = vector.multi_reduction <maximumf>, %8, %cst_10 [1] : vector<8x128xf32> to vector<8xf32>
    %13 = vector.shape_cast %12 : vector<8xf32> to vector<8x1xf32>
    %14 = arith.maximumf %11, %13 : vector<8x1xf32>
    %c0_11 = arith.constant 0 : index
    %c0_12 = arith.constant 0 : index
    %15 = vector.load %arg11[%c0_11, %c0_12] : memref<8x1xf32, #tpu.memory_space<vmem>>, vector<8x1xf32>
    %c0_13 = arith.constant 0 : index
    %c0_14 = arith.constant 0 : index
    %16 = vector.load %arg10[%c0_13, %c0_14] : memref<8x1xf32, #tpu.memory_space<vmem>>, vector<8x1xf32>
    %17 = arith.subf %16, %14 : vector<8x1xf32>
    %18 = math.exp %17 : vector<8x1xf32>
    %19 = arith.mulf %15, %18 : vector<8x1xf32>
    %20 = vector.broadcast %14 : vector<8x1xf32> to vector<8x128xf32>
    %21 = arith.subf %8, %20 : vector<8x128xf32>
    %22 = math.exp %21 : vector<8x128xf32>
    %cst_15 = arith.constant dense<0.000000e+00> : vector<8xf32>
    %23 = vector.multi_reduction <add>, %22, %cst_15 [1] : vector<8x128xf32> to vector<8xf32>
    %24 = vector.shape_cast %23 : vector<8xf32> to vector<8x1xf32>
    %25 = arith.addf %19, %24 : vector<8x1xf32>
    %c0_16 = arith.constant 0 : index
    %c0_17 = arith.constant 0 : index
    %26 = vector.load %arg11[%c0_16, %c0_17] : memref<8x1xf32, #tpu.memory_space<vmem>>, vector<8x1xf32>
    tpu.vector_store %arg11[%c0_16, %c0_17], %25 {strides = array<i32>} : memref<8x1xf32, #tpu.memory_space<vmem>>, vector<8x1xf32>,
    %c0_18 = arith.constant 0 : index
    %c0_19 = arith.constant 0 : index
    %27 = vector.load %arg10[%c0_18, %c0_19] : memref<8x1xf32, #tpu.memory_space<vmem>>, vector<8x1xf32>
    tpu.vector_store %arg10[%c0_18, %c0_19], %14 {strides = array<i32>} : memref<8x1xf32, #tpu.memory_space<vmem>>, vector<8x1xf32>,
    %c0_i32_20 = arith.constant 0 : i32
    %28 = arith.cmpi eq, %arg1, %c0_i32_20 : i32
    %29 = arith.extui %28 : i1 to i32
    %c0_i32_21 = arith.constant 0 : i32
    %30 = arith.cmpi ne, %29, %c0_i32_21 : i32
    scf.if %30 {
      %c0_22 = arith.constant 0 : index
      %c0_23 = arith.constant 0 : index
      %31 = vector.load %arg10[%c0_22, %c0_23] : memref<8x1xf32, #tpu.memory_space<vmem>>, vector<8x1xf32>
      %c0_24 = arith.constant 0 : index
      %c0_25 = arith.constant 0 : index
      %32 = vector.load %arg11[%c0_24, %c0_25] : memref<8x1xf32, #tpu.memory_space<vmem>>, vector<8x1xf32>
      %33 = math.log %32 : vector<8x1xf32>
      %34 = arith.addf %31, %33 : vector<8x1xf32>
      %c0_26 = arith.constant 0 : index
      %c0_27 = arith.constant 0 : index
      %35 = vector.load %arg8[%c0_26, %c0_27] : memref<8x1xf32, #tpu.memory_space<vmem>>, vector<8x1xf32>
      tpu.vector_store %arg8[%c0_26, %c0_27], %34 {strides = array<i32>} : memref<8x1xf32, #tpu.memory_space<vmem>>, vector<8x1xf32>,
    } else {
    }
    return
  }
  func.func @transform_0(%arg0: i32, %arg1: i32) -> (i32, i32) {
    %c0_i32 = arith.constant 0 : i32
    %c0_i32_0 = arith.constant 0 : i32
    return %arg0, %c0_i32 : i32, i32
  }
  func.func @transform_1(%arg0: i32, %arg1: i32) -> (i32, i32) {
    %c0_i32 = arith.constant 0 : i32
    %c0_i32_0 = arith.constant 0 : i32
    %c0_i32_1 = arith.constant 0 : i32
    return %c0_i32, %c0_i32_0 : i32, i32
  }
  func.func @transform_2(%arg0: i32, %arg1: i32) -> (i32, i32) {
    %c0_i32 = arith.constant 0 : i32
    %c0_i32_0 = arith.constant 0 : i32
    %c0_i32_1 = arith.constant 0 : i32
    return %c0_i32, %c0_i32_0 : i32, i32
  }
  func.func @transform_3(%arg0: i32, %arg1: i32) -> (i32, i32) {
    %c0_i32 = arith.constant 0 : i32
    %c0_i32_0 = arith.constant 0 : i32
    return %c0_i32, %arg1 : i32, i32
  }
  func.func @transform_4(%arg0: i32, %arg1: i32) -> (i32, i32) {
    %c0_i32 = arith.constant 0 : i32
    %c0_i32_0 = arith.constant 0 : i32
    return %c0_i32, %arg1 : i32, i32
  }
  func.func @transform_5(%arg0: i32, %arg1: i32) -> (i32, i32) {
    %c0_i32 = arith.constant 0 : i32
    return %arg0, %arg1 : i32, i32
  }
  func.func @transform_6(%arg0: i32, %arg1: i32) -> (i32, i32) {
    %c0_i32 = arith.constant 0 : i32
    %c0_i32_0 = arith.constant 0 : i32
    return %arg0, %c0_i32 : i32, i32
  }
}

</mosaic_0001>

<bundles_post_ra>
// kernel: tpu_custom_call.1
= control target key start
LH: loop header
LB: loop body
LE: loop exit
PB: predicated region body
PF: predicated region fallthrough
CT: control target
= control target key end

     0   :  { %12 = vsyncpa [#allocation6], 0  ;;  %s526_s0 = inlined_call_operand.hbm [shape: bf16[8,32], index: 0, kind: input, shape index: {}]   ;;  %s527_s1 = inlined_call_operand.hbm [shape: bf16[32,32], index: 1, kind: input, shape index: {}]   ;;  %s528_s2 = inlined_call_operand.vmem [shape: f32[1,32], index: 2, kind: input, shape index: {}]   ;;  %s529_s3 = inlined_call_operand.hbm [shape: bf16[32,128], index: 3, kind: input, shape index: {}]   ;;  %s530_s4 = inlined_call_operand.vmem [shape: f32[1,128], index: 4, kind: input, shape index: {}]   ;;  %s531_s5 = inlined_call_operand.hbm [shape: bf16[8,128], index: 5, kind: output, shape index: {0}]   ;;  %s532_s6 = inlined_call_operand.vmem [shape: f32[8,1], index: 6, kind: output, shape index: {1}]  }
   0x1   :  { %13 = vsyncpa [#allocation9], 0 }
   0x2   :  { %14 = vsyncpa [#allocation7], 0  ;;  %s411_s21 = smov [#allocation8]   ;;  %s317_s25 = scalar_lea.hbm %s527_s1, 256 }
   0x3   :  { %s30_s22 = sshll.u32 %s411_s21, 4  ;;  %p318_p0 = scmp.ne.s32.totalorder %s527_s1, %s317_s25  ;;  %s31_s22 = int_to_ptr.vmem [resolvable:$true] %s30_s22 }
   0x4   :  { %p321_p1 = scmp.lt.u32.totalorder %s317_s25, %s527_s1 }
   0x6   :  { %p323_p2 = pnand %p321_p1, %p318_p0 }
   0x8   :  { %326 = shalt.err (!%p323_p2)
}
   0x9   :  { %s327_s30 = scalar_lea.vmem %s31_s22, 256  ;;  %p332_p4 = scmp.lt.s32.totalorder %s31_s22, %s31_s22 }
   0xa   :  { %p328_p3 = scmp.ne.s32.totalorder %s31_s22, %s327_s30  ;;  %p333_p5 = scmp.lt.s32.totalorder %s327_s30, %s327_s30 }
   0xc   :  { %p334_p6 = por %p333_p5, %p332_p4 }
   0xe   :  { %p335_p7 = pnand %p334_p6, %p328_p3 }
  0x10   :  { %338 = shalt.err (!%p335_p7)
}
  0x11   :  { %s412_s7 = smov 64   ;;  %s413_s8 = smov 4  }
  0x12   :  { %36 = dma.hbm_to_vmem [thread:$0]  %s527_s1, 256, %s31_s22, [#allocation9], %s412_s7, %s412_s7, %s413_s8  }
  0x13   :  { %s414_s11 = smov [#allocation5]   ;;  %s415_s13 = smov [#allocation10]  }
  0x14   :  { %s21_s12 = sshll.u32 %s414_s11, 4  ;;  %s44_s14 = sshll.u32 %s415_s13, 4  ;;  %s22_s12 = int_to_ptr.vmem [resolvable:$true] %s21_s12  ;;  %s45_s14 = int_to_ptr.vmem [resolvable:$true] %s44_s14 }
  0x15   :  { %s339_s17 = scalar_lea.hbm %s526_s0, 64 }
  0x16   :  { %p340_p8 = scmp.ne.s32.totalorder %s526_s0, %s339_s17  ;;  %p343_p9 = scmp.lt.u32.totalorder %s339_s17, %s526_s0 }
  0x18   :  { %p345_p10 = pnand %p343_p9, %p340_p8 }
  0x1a   :  { %348 = shalt.err (!%p345_p10)
}
  0x1b   :  { %s349_s1 = scalar_lea.vmem %s22_s12, 64  ;;  %p354_p12 = scmp.lt.s32.totalorder %s22_s12, %s22_s12 }
  0x1c   :  { %p350_p11 = scmp.ne.s32.totalorder %s22_s12, %s349_s1  ;;  %p355_p13 = scmp.lt.s32.totalorder %s349_s1, %s349_s1 }
  0x1e   :  { %p356_p0 = por %p355_p13, %p354_p12 }
  0x20   :  { %p357_p1 = pnand %p356_p0, %p350_p11 }
  0x22   :  { %360 = shalt.err (!%p357_p1)
}
  0x23   :  { %24 = dma.hbm_to_vmem [thread:$0]  %s526_s0, 64, %s22_s12, [#allocation6]  }
  0x24   :  { %s361_s26 = scalar_lea.hbm %s529_s3, 256 }
  0x25   :  { %p362_p2 = scmp.ne.s32.totalorder %s529_s3, %s361_s26  ;;  %p365_p3 = scmp.lt.u32.totalorder %s361_s26, %s529_s3 }
  0x27   :  { %p367_p4 = pnand %p365_p3, %p362_p2 }
  0x29   :  { %370 = shalt.err (!%p367_p4)
}
  0x2a   :  { %s371_s9 = scalar_lea.vmem %s45_s14, 256  ;;  %p376_p6 = scmp.lt.s32.totalorder %s45_s14, %s45_s14 }
  0x2b   :  { %p372_p5 = scmp.ne.s32.totalorder %s45_s14, %s371_s9  ;;  %p377_p7 = scmp.lt.s32.totalorder %s371_s9, %s371_s9 }
  0x2d   :  { %p378_p8 = por %p377_p7, %p376_p6 }
  0x2f   :  { %p379_p9 = pnand %p378_p8, %p372_p5 }
  0x31   :  { %382 = shalt.err (!%p379_p9)
}
  0x32   :  { %50 = dma.hbm_to_vmem [thread:$0]  %s529_s3, 256, %s45_s14, [#allocation9], %s412_s7, %s412_s7, %s413_s8  }
  0x33   :  { %405 = dma.done.wait [#allocation6], 64  }
  0x34   :  { %406 = vsyncadd [#allocation6], 4294967232 }
  0x35   :  { %407 = dma.done.wait [#allocation9], 512  }
  0x36   :  { %408 = vsyncadd [#allocation9], 4294966784  ;;  %v416_v0 = vmov 0.0   ;;  %vm417_vm0 = vmmov 0   ;;  %v305_v1 = vld [vmem:[#allocation8] sm:$0xff]   ;;  %v306_v2 = vld [vmem:[#allocation8 + $0x8] sm:$0xff]  }
  0x37   :  { %278 = vmatprep.subr.bf16.mxu0 %v416_v0  ;;  %282 = vmatprep.mubr.msk.bf16.mxu0 %vm417_vm0, %v416_v0  ;;  %v67_v3 = vld [vmem:[#allocation5] sm:$0xf]  ;;  %vm91_vm1 = vcmask 261120   ;;  %v307_v4 = vld [vmem:[#allocation10] sm:$0xff]   ;;  %v264_v6 = vld [vmem:[%s528_s2] ss:$0 sm:$0xff] }
  0x38   :  { %286 = vmatprep.subr.bf16.mxu1 %v416_v0  ;;  %290 = vmatprep.mubr.msk.bf16.mxu1 %vm417_vm0, %v416_v0  ;;  %v308_v5 = vld [vmem:[#allocation10 + $0x8] sm:$0xff]   ;;  %vm137_vm2 = vcmask 257024   ;;  %vm139_vm3 = vcmask 7168   ;;  %v418_v15 = vmov -1e+30   ;;  %v419_v23 = vmov 0  }
  0x39   :  { %279 = vmatpush3.bf16.msra.mxu0 %v305_v1  ;;  %287 = vmatpush3.bf16.msra.mxu1 %v307_v4  ;;  %140 = vst.msk [vmem:[#allocation3] sm:$0xff] %vm139_vm3, %v418_v15  ;;  %141 = vst.msk [vmem:[#allocation4] sm:$0xff] %vm139_vm3, %v416_v0  ;;  %v268_v16 = vld [vmem:[%s530_s4] ss:$0 sm:$0xff]  ;;  %s420_s4 = smov [#allocation11]  }
  0x3a   :  { %280 = vmatprep.subr.bf16.mxu0 %v416_v0  ;;  %288 = vmatprep.subr.bf16.mxu1 %v416_v0  ;;  %s250_s11 = sshll.u32 %s420_s4, 4  ;;  %s251_s11 = int_to_ptr.vmem [resolvable:$true] %s250_s11 }
  0x3b   :  { %304 = vset.pattern.permute.xlu0 %v419_v23  ;;  %s383_s12 = scalar_lea.vmem %s251_s11, 64  ;;  %p388_p11 = scmp.lt.s32.totalorder %s251_s11, %s251_s11 }
  0x3c   :  { %p384_p10 = scmp.ne.s32.totalorder %s251_s11, %s383_s12  ;;  %p389_p12 = scmp.lt.s32.totalorder %s383_s12, %s383_s12 }
  0x3d   :  { %281 = vmatpush3.bf16.msra.mxu0 %v306_v2  ;;  %289 = vmatpush3.bf16.msra.mxu1 %v308_v5 }
  0x3e   :  { %p390_p13 = por %p389_p12, %p388_p11 }
  0x40   :  { %283 = vmatmul.mubr.msk.bf16.vlgmr.msra.gmra.mrb[0].mxu0 %vm91_vm1, %v67_v3  ;;  %v212_v24 = vld [vmem:[#allocation3] sm:$0xff]  ;;  %p391_p0 = pnand %p390_p13, %p384_p10 }
 0x113   :  { %v129_v7 = vpop.f32.mrb[0].mxu0 }
 0x114   :  { %v130_v8 = vadd.f32 %v264_v6, %v129_v7  ;;  %v284_v9 = vpop.f32.mrb[1].mxu0 }
 0x115   :  { %v132_v10 = vpop.f32.mrb[2].mxu0 }
 0x116   :  { %309 = vtanh.f32 %v130_v8  ;;  %v285_v11 = vpop.f32.mrb[3].mxu0 }
 0x120   :  { %v310_v12 = vpop.eup %309 }
 0x121   :  { %v136_v13 = vpack.c.bf16 %v310_v12, %v310_v12 }
 0x123   :  { %138 = vst.msk [vmem:[#allocation2] sm:$0xf] %vm137_vm2, %v136_v13 }
 0x12a   :  { %v142_v14 = vld [vmem:[#allocation2] sm:$0xf] }
 0x12b   :  { %291 = vmatmul.mubr.msk.bf16.vlgmr.msra.gmra.mrb[0].mxu1 %vm91_vm1, %v142_v14 }
 0x1fe   :  { %v204_v17 = vpop.f32.mrb[0].mxu1 }
 0x1ff   :  { %v205_v18 = vadd.f32 %v268_v16, %v204_v17  ;;  %v292_v19 = vpop.f32.mrb[1].mxu1 }
 0x200   :  { %v207_v20 = vpop.f32.mrb[2].mxu1 }
 0x201   :  { %213 = vmax.xlane.f32.xlu0 %v205_v18  ;;  %v293_v21 = vpop.f32.mrb[3].mxu1  ;;  %v210_v22 = vpack.c.bf16 %v205_v18, %v205_v18 }
 0x203   :  { %211 = vst [vmem:[#allocation11] sm:$0xf] %v210_v22 }
 0x28e   :  { %v214_v25 = vpop.xlane.xlu0 %213 }
 0x28f   :  { %v215_v26 = vmax.f32 %v212_v24, %v214_v25 }
 0x291   :  { %v217_v27 = vsub.f32 %v212_v24, %v215_v26  ;;  %234 = vst.msk [vmem:[#allocation3] sm:$0xff] %vm139_vm3, %v215_v26  ;;  %223 = vperm.xlu0 %304, %v215_v26  }
 0x310   :  { %v224_v28 = vpop.permute.xlu0 %223 }
 0x311   :  { %v226_v29 = vsub.f32 %v205_v18, %v224_v28 }
 0x313   :  { %v227_v30 = vmul.f32 1.442695, %v226_v29 }
 0x315   :  { %311 = vpow2.f32 %v227_v30 }
 0x31f   :  { %v312_v31 = vpop.eup %311 }
 0x320   :  { %229 = vadd.xlane.f32.xlu1 %v312_v31 }
 0x321   :  { %394 = shalt.err (!%p391_p0)
}
 0x322   :  { %s395_s15 = scalar_lea.hbm %s531_s5, 64 }
 0x323   :  { %p396_p1 = scmp.ne.s32.totalorder %s531_s5, %s395_s15  ;;  %p399_p2 = scmp.lt.u32.totalorder %s395_s15, %s531_s5 }
 0x325   :  { %p401_p3 = pnand %p399_p2, %p396_p1 }
 0x327   :  { %404 = shalt.err (!%p401_p3)
}
 0x328   :  { %253 = dma.vmem_to_hbm [thread:$0]  %s251_s11, 64, %s531_s5, [#allocation7]   ;;  %v218_v32 = vmul.f32 1.442695, %v217_v27  ;;  %v216_v34 = vld [vmem:[#allocation4] sm:$0xff]  ;;  %v238_v41 = vld [vmem:[#allocation3] sm:$0xff] }
 0x32a   :  { %313 = vpow2.f32 %v218_v32 }
 0x334   :  { %v314_v33 = vpop.eup %313 }
 0x335   :  { %v220_v35 = vmul.f32 %v314_v33, %v216_v34 }
 0x3ad   :  { %v230_v36 = vpop.xlane.xlu1 %229 }
 0x3ae   :  { %v231_v37 = vadd.f32 %v230_v36, %v220_v35 }
 0x3b0   :  { %233 = vst.msk [vmem:[#allocation4] sm:$0xff] %vm139_vm3, %v231_v37 }
 0x3b7   :  { %v239_v38 = vld [vmem:[#allocation4] sm:$0xff] }
 0x3b8   :  { %315 = vlog2.f32 %v239_v38 }
 0x3c2   :  { %v316_v39 = vpop.eup %315 }
 0x3c3   :  { %v241_v40 = vmul.f32 0.6931472, %v316_v39 }
 0x3c5   :  { %v242_v42 = vadd.f32 %v241_v40, %v238_v41 }
 0x3c7   :  { %243 = vst.msk [vmem:[%s532_s6] sm:$0xff] %vm139_vm3, %v242_v42 }
 0x3c8   :  { %409 = dma.done.wait [#allocation7], 64  }
 0x3c9   :  { %410 = vsyncadd [#allocation7], 4294967232 }
 0x3ca   :  { %261 = vsyncpa [#allocation6], 1 }
 0x3cb   :  { %262 = vsyncpa [#allocation9], 1 }
 0x3cc   :  { %263 = vsyncpa [#allocation7], 1 }

</bundles_post_ra>
